<compile_context>
chip_gen: v7x
topology: tpu7x:2x2x1
jax: 0.10.0
libtpu: 0.0.40
codegen_flags: <defaults>
</compile_context>

<pallas_src>
import functools

import jax
import jax.numpy as jnp
import numpy as np
from jax import lax
from jax.experimental import pallas as pl
from jax.experimental.pallas import tpu as pltpu


def _round_up(x, m):
    return (x + m - 1) // m * m


def _phase_taps(K, s, p):
    """Per-output-phase tap table for a 1-D transposed conv (stride s, pad p).

    Returns (kidx, valid, pad_left, J), kidx/valid of shape (s, J), such that
        y[q*s + r] = sum_j x_pad[q + j] * w[kidx[r, j]]      (masked by valid)
    where x_pad is x zero-padded by `pad_left` on the left.  All phases share
    the same J-tap window, so they can be stacked on the output-channel axis.
    """
    r = np.arange(s)
    c = (r + p) % s                         # tap-index residue used by phase r
    t = (r + p) // s
    n_taps = np.maximum(0, -(-(K - c) // s))        # ceil((K - c)/s), >= 0
    pad_left = int(np.max(np.maximum(0, n_taps - 1 - t)))
    J = int(np.max(t)) + pad_left + 1
    j = np.arange(J)
    m = t[:, None] + pad_left - j[None, :]          # (s, J)
    k = m * s + c[:, None]                          # original kernel tap index
    valid = (m >= 0) & (k >= 0) & (k < K)
    kidx = np.where(valid, k, 0).astype(np.int32)
    return kidx, valid, pad_left, J


def _dim_geometry(Din, K, s, p, op):
    Dout = (Din - 1) * s - 2 * p + (K - 1) + op + 1
    kidx, valid, pad_left, J = _phase_taps(K, s, p)
    Q = -(-Dout // s)                               # phase-grid extent (ceil)
    pad_right = Q + J - 1 - pad_left - Din          # may be negative (trim)
    return dict(Dout=Dout, Q=Q, J=J, pad_left=pad_left, pad_right=pad_right,
                kidx=kidx, valid=valid)


def _im2col_matmul_kernel(p_ref, w_ref, o_ref, *, apply_relu):
    # p_ref : (tile_m, Kp)     bf16 im2col patches (lane-dense, Kp % 128 == 0)
    # w_ref : (Kp, CoutP)      bf16 polyphase weights (CoutP % 128 == 0)
    # o_ref : (tile_m, CoutP)  f32 output tile (lane-dense stores)
    acc = jnp.dot(p_ref[...], w_ref[...], preferred_element_type=jnp.float32)
    if apply_relu:
        acc = jnp.maximum(acc, 0.0)
    o_ref[...] = acc.astype(o_ref.dtype)


@functools.partial(jax.jit,
                   static_argnames=("stride", "padding", "output_padding",
                                    "apply_relu"))
def conv_transpose3d(x, weight, *, stride=1, padding=0, output_padding=0,
                     apply_relu=False):
    """x: (N, Cin, D, H, W) NCDHW.  weight: (Cin, Cout, kD, kH, kW) (torch layout)."""
    N, Cin, D, H, W = x.shape
    wCin, Cout, kD, kH, kW = weight.shape
    assert wCin == Cin
    s, p, op = stride, padding, output_padding

    gd = _dim_geometry(D, kD, s, p, op)
    gh = _dim_geometry(H, kH, s, p, op)
    gw = _dim_geometry(W, kW, s, p, op)
    Dout, Hout, Wout = gd["Dout"], gh["Dout"], gw["Dout"]
    Qd, Qh, Qw = gd["Q"], gh["Q"], gw["Q"]
    Jd, Jh, Jw = gd["J"], gh["J"], gw["J"]

    # ---- polyphase weight slab (built once): (Jd*Jh*Jw*Cin, s^3*Cout) ------
    w5 = jnp.transpose(weight, (2, 3, 4, 0, 1))          # (kD, kH, kW, Cin, Cout)
    wsel = w5[gd["kidx"]]                                # (s, Jd, kH, kW, Cin, Cout)
    wsel = jnp.where(jnp.asarray(gd["valid"])[:, :, None, None, None, None],
                     wsel, 0.0)
    wsel = wsel[:, :, gh["kidx"]]                        # (s, Jd, s, Jh, kW, Cin, Cout)
    wsel = jnp.where(jnp.asarray(gh["valid"])[None, None, :, :, None, None, None],
                     wsel, 0.0)
    wsel = wsel[:, :, :, :, gw["kidx"]]                  # (s, Jd, s, Jh, s, Jw, Cin, Cout)
    wsel = jnp.where(jnp.asarray(gw["valid"])[None, None, None, None, :, :, None, None],
                     wsel, 0.0)
    # -> (jd, jh, jw, Cin | rd, rh, rw, Cout) and flatten to a 2-D matmul slab
    wbig = jnp.transpose(wsel, (1, 3, 5, 6, 0, 2, 4, 7))
    Ktot = Jd * Jh * Jw * Cin
    CoutB = s * s * s * Cout
    wbig = wbig.reshape(Ktot, CoutB).astype(jnp.bfloat16)

    # ---- compact (no zero-upsampling) input, channels-last, bf16 -----------
    x_ndhwc = jnp.transpose(x, (0, 2, 3, 4, 1)).astype(jnp.bfloat16)
    x_cpad = lax.pad(x_ndhwc, jnp.zeros((), jnp.bfloat16),
                     [(0, 0, 0),
                      (gd["pad_left"], gd["pad_right"], 0),
                      (gh["pad_left"], gh["pad_right"], 0),
                      (gw["pad_left"], gw["pad_right"], 0),
                      (0, 0, 0)])

    # ---- im2col on the compact input: (M, Ktot), M = N*Qd*Qh*Qw ------------
    cols = []
    for jd in range(Jd):
        for jh in range(Jh):
            for jw in range(Jw):
                cols.append(x_cpad[:, jd:jd + Qd, jh:jh + Qh, jw:jw + Qw, :])
    patches = jnp.stack(cols, axis=-2)                   # (N,Qd,Qh,Qw,Jd*Jh*Jw,Cin)
    Mtot = N * Qd * Qh * Qw
    patches = patches.reshape(Mtot, Ktot)

    # ---- lane-dense zero padding of K / Cout, M tiling ----------------------
    Kp = _round_up(Ktot, 128)
    CoutP = _round_up(CoutB, 128)
    if Mtot >= 512:
        tile_m = 256
    else:  # keep >= 2 grid steps when possible so both v7x TCs get work
        tile_m = max(16, _round_up(-(-Mtot // 2), 16))
    Mp = _round_up(Mtot, tile_m)

    patches = jnp.pad(patches, ((0, Mp - Mtot), (0, Kp - Ktot)))
    wbig = jnp.pad(wbig, ((0, Kp - Ktot), (0, CoutP - CoutB)))
    grid_m = Mp // tile_m

    kernel = functools.partial(_im2col_matmul_kernel, apply_relu=apply_relu)
    out2d = pl.pallas_call(
        kernel,
        out_shape=jax.ShapeDtypeStruct((Mp, CoutP), jnp.float32),
        grid_spec=pltpu.PrefetchScalarGridSpec(
            num_scalar_prefetch=0,
            grid=(grid_m,),
            in_specs=[
                pl.BlockSpec((tile_m, Kp), lambda i: (i, 0)),
                pl.BlockSpec((Kp, CoutP), lambda i: (0, 0)),
            ],
            out_specs=pl.BlockSpec((tile_m, CoutP), lambda i: (i, 0)),
        ),
        compiler_params=pltpu.CompilerParams(
            dimension_semantics=("parallel",),
            vmem_limit_bytes=32 * 1024 * 1024),
    )(patches, wbig)

    # ---- drop padding, interleave the s^3 phases (pixel shuffle), -> NCDHW --
    out = out2d[:Mtot, :CoutB].reshape(N, Qd, Qh, Qw, s, s, s, Cout)
    out = jnp.transpose(out, (0, 1, 4, 2, 5, 3, 6, 7))   # (N, Qd, rd, Qh, rh, Qw, rw, Cout)
    out = out.reshape(N, Qd * s, Qh * s, Qw * s, Cout)
    out = out[:, :Dout, :Hout, :Wout, :]
    return jnp.transpose(out, (0, 4, 1, 2, 3)).astype(x.dtype)


# TODO(synk): norm='bn' path (nn.BatchNorm3d, training-mode batch statistics)
# is not implemented; this reproduces the default norm=None / activation=None
# (Identity) configuration, with an optional fused ReLU available in-kernel.


if __name__ == "__main__":
    key = jax.random.PRNGKey(0)
    kx, kw = jax.random.split(key)

    # Small shapes consistent with the module's forward (NCDHW input).
    N, Cin, Cout = 2, 8, 16
    D = H = W = 4
    ksize, stride, padding = 3, 2, 1
    output_padding = 1  # = the torch module's `dilation` arg (positional slip)

    x = jax.random.normal(kx, (N, Cin, D, H, W), jnp.float32)
    weight = 0.1 * jax.random.normal(
        kw, (Cin, Cout, ksize, ksize, ksize), jnp.float32)  # torch ConvTranspose3d layout

    out = conv_transpose3d(x, weight, stride=stride, padding=padding,
                           output_padding=output_padding, apply_relu=False)
    out = jax.block_until_ready(out)
    assert out.shape == (N, Cout, 2 * D, 2 * H, 2 * W), out.shape

    # Independent reference on the same bf16-rounded operands (the kernel uses
    # bf16 MXU operands with an f32 accumulator), via XLA's fractionally
    # strided convolution.
    x_bf = x.astype(jnp.bfloat16).astype(jnp.float32)
    w_bf = weight.astype(jnp.bfloat16).astype(jnp.float32)
    w_ref = jnp.transpose(jnp.flip(w_bf, axis=(2, 3, 4)),
                          (1, 0, 2, 3, 4))  # (Cout, Cin, kD, kH, kW)
    ref = lax.conv_general_dilated(
        x_bf, w_ref,
        window_strides=(1, 1, 1),
        padding=[(ksize - 1 - padding, ksize - 1 - padding + output_padding)] * 3,
        lhs_dilation=(stride, stride, stride),
        dimension_numbers=("NCDHW", "OIDHW", "NCDHW"),
        precision=lax.Precision.HIGHEST)

    np.testing.assert_allclose(np.asarray(out), np.asarray(ref),
                               atol=2e-3, rtol=2e-3)
    print("KERNEL_OK")
</pallas_src>

<mosaic_0001>
module attributes {stable_mosaic.version = 11 : i64} {
  func.func @_im2col_matmul_kernel(%arg0: i32, %arg1: memref<64x128xbf16, #tpu.memory_space<vmem>>, %arg2: memref<128x128xbf16, #tpu.memory_space<vmem>>, %arg3: memref<64x128xf32, #tpu.memory_space<vmem>>) attributes {dimension_semantics = [#tpu.dimension_semantics<parallel>], iteration_bounds = array<i64: 2>, scalar_prefetch = 0 : i64, scratch_operands = 0 : i64, tpu.core_type = #tpu.core_type<tc>, window_params = [{transform_indices = @transform_0, window_bounds = array<i64: 64, 128>}, {pipeline_mode = #tpu.pipeline_mode<synchronous>, transform_indices = @transform_1, window_bounds = array<i64: 128, 128>}, {transform_indices = @transform_2, window_bounds = array<i64: 64, 128>}]} {
    %c0 = arith.constant 0 : index
    %c0_0 = arith.constant 0 : index
    %0 = vector.load %arg1[%c0, %c0_0] : memref<64x128xbf16, #tpu.memory_space<vmem>>, vector<64x128xbf16>
    %c0_1 = arith.constant 0 : index
    %c0_2 = arith.constant 0 : index
    %1 = vector.load %arg2[%c0_1, %c0_2] : memref<128x128xbf16, #tpu.memory_space<vmem>>, vector<128x128xbf16>
    %cst = arith.constant dense<0.000000e+00> : vector<64x128xf32>
    %2 = tpu.matmul %0, %1, %cst {dimension_numbers = #tpu.dot_dimension_numbers<[1], [0], [0], [1], [0, 0, 1, 1], [], []>} : vector<64x128xbf16>, vector<128x128xbf16>, vector<64x128xf32> -> vector<64x128xf32>
    %c0_3 = arith.constant 0 : index
    %c0_4 = arith.constant 0 : index
    %3 = vector.load %arg3[%c0_3, %c0_4] : memref<64x128xf32, #tpu.memory_space<vmem>>, vector<64x128xf32>
    tpu.vector_store %arg3[%c0_3, %c0_4], %2 {strides = array<i32>} : memref<64x128xf32, #tpu.memory_space<vmem>>, vector<64x128xf32>,
    return
  }
  func.func @transform_0(%arg0: i32) -> (i32, i32) {
    %c0_i32 = arith.constant 0 : i32
    %c0_i32_0 = arith.constant 0 : i32
    return %arg0, %c0_i32 : i32, i32
  }
  func.func @transform_1(%arg0: i32) -> (i32, i32) {
    %c0_i32 = arith.constant 0 : i32
    %c0_i32_0 = arith.constant 0 : i32
    %c0_i32_1 = arith.constant 0 : i32
    return %c0_i32, %c0_i32_0 : i32, i32
  }
  func.func @transform_2(%arg0: i32) -> (i32, i32) {
    %c0_i32 = arith.constant 0 : i32
    %c0_i32_0 = arith.constant 0 : i32
    return %arg0, %c0_i32 : i32, i32
  }
}

</mosaic_0001>

<bundles_post_ra>
// kernel: conv_transpose3d.1
= control target key start
LH: loop header
LB: loop body
LE: loop exit
PB: predicated region body
PF: predicated region fallthrough
CT: control target
= control target key end

     0   :  { %s491_s9 = smov 0   ;;  %s542_s0 = inlined_call_operand.vmem [shape: bf16[128,128], index: 0, kind: input, shape index: {}]   ;;  %s543_s1 = inlined_call_operand.vmem [shape: bf16[128,128], index: 1, kind: input, shape index: {}]   ;;  %s544_s2 = inlined_call_operand.vmem [shape: f32[128,128], index: 2, kind: output, shape index: {}]  }
   0x1 LB: > { %s373_s10 = sadd.s32 4294967295, %s474_s9   ;;  %p377_p0 = scmp.ge.s32.totalorder %s474_s9, 1  ;;  %s474_s9 = sphi %s491_s9, %s12_s9  }
   0x2   : > { %p113_p1 = scmp.lt.s32.totalorder %s474_s9, 3 }
   0x4   : > { %p114_p2 = pnand %p377_p0, %p113_p1 }
   0x5   : > { %v456_v0 = vld [vmem:[%s543_s1] sm:$0xff] (!%p114_p2)   ;;  %s378_s13 = sshll.u32 (!%p114_p2), %s373_s10, 3  ;;  %v457_v1 = vld [vmem:[%s543_s1 + $0x8] sm:$0xff] (!%p114_p2)   ;;  %v458_v2 = vld [vmem:[%s543_s1 + $0x10] sm:$0xff] (!%p114_p2)  }
   0x6   : > { %117 = sbr.rel (%p114_p2) target bundleno = 254 (0xfe), region = 28  ;;  %p136_p3 = scmp.lt.s32.totalorder (!%p114_p2), %s378_s13, 15  ;;  %408 = vmatprep.subr.bf16.mxu0 (!%p114_p2), %v456_v0  ;;  %432 = vmatprep.subr.bf16.mxu1 (!%p114_p2), %v456_v0  ;;  %v459_v3 = vld [vmem:[%s543_s1 + $0x18] sm:$0xff] (!%p114_p2)   ;;  %v460_v6 = vld [vmem:[%s543_s1 + $0x20] sm:$0xff] (!%p114_p2)   ;;  %v461_v7 = vld [vmem:[%s543_s1 + $0x28] sm:$0xff] (!%p114_p2)  }
   0x7   : > { %409 = vmatpush3.bf16.msra.mxu0 (!%p114_p2), %v456_v0  ;;  %440 = vmatpush3.bf16.msra.mxu1 (!%p114_p2), %v456_v0  ;;  %v462_v8 = vld [vmem:[%s543_s1 + $0x30] sm:$0xff] (!%p114_p2)   ;;  %v463_v9 = vld [vmem:[%s543_s1 + $0x38] sm:$0xff] (!%p114_p2)  }
   0x8   : > { %410 = vmatprep.subr.bf16.mxu0 (!%p114_p2), %v457_v1  ;;  %433 = vmatprep.subr.bf16.mxu1 (!%p114_p2), %v457_v1 }
   0xb   : > { %411 = vmatpush3.bf16.msra.mxu0 (!%p114_p2), %v457_v1  ;;  %441 = vmatpush3.bf16.msra.mxu1 (!%p114_p2), %v457_v1 }
   0xc   : > { %412 = vmatprep.subr.bf16.mxu0 (!%p114_p2), %v458_v2  ;;  %434 = vmatprep.subr.bf16.mxu1 (!%p114_p2), %v458_v2 }
   0xd   : > { %s546_s13 = smov (!%p136_p3, %s378_s13), 15 }
   0xe   : > { %s379_s18 = sshll.u32 %s546_s13, 2  ;;  %s381_s4 = sshll.u32 %s546_s13, 3 }
   0xf   : > { %s514_s21 = scalar_lea.vmem %s542_s0, %s379_s18  ;;  %413 = vmatpush3.bf16.msra.mxu0 %v458_v2  ;;  %442 = vmatpush3.bf16.msra.mxu1 %v458_v2  ;;  %s145_s7 = scalar_lea.vmem %s544_s2, %s381_s4 }
  0x10   : > { %v464_v4 = vld [vmem:[%s514_s21] sm:$0xff]   ;;  %v465_v5 = vld [vmem:[%s514_s21 + $0x10] sm:$0xff]   ;;  %414 = vmatprep.subr.bf16.mxu0 %v459_v3  ;;  %435 = vmatprep.subr.bf16.mxu1 %v459_v3  ;;  %v466_v10 = vld [vmem:[%s514_s21 + $0x8] sm:$0xff]  }
  0x11   : > { %424 = vmatprep.mubr.bf16.mxu0 %v464_v4  ;;  %428 = vmatprep.mubr.bf16.mxu1 %v465_v5  ;;  %v467_v11 = vld [vmem:[%s514_s21 + $0x18] sm:$0xff]  }
  0x13   : > { %415 = vmatpush3.bf16.msra.mxu0 %v459_v3  ;;  %443 = vmatpush3.bf16.msra.mxu1 %v459_v3 }
  0x14   : > { %416 = vmatprep.subr.bf16.mxu0 %v460_v6  ;;  %436 = vmatprep.subr.bf16.mxu1 %v460_v6 }
  0x17   : > { %417 = vmatpush3.bf16.msra.mxu0 %v460_v6  ;;  %444 = vmatpush3.bf16.msra.mxu1 %v460_v6 }
  0x18   : > { %418 = vmatprep.subr.bf16.mxu0 %v461_v7  ;;  %437 = vmatprep.subr.bf16.mxu1 %v461_v7 }
  0x1b   : > { %419 = vmatpush3.bf16.msra.mxu0 %v461_v7  ;;  %445 = vmatpush3.bf16.msra.mxu1 %v461_v7 }
  0x1c   : > { %420 = vmatprep.subr.bf16.mxu0 %v462_v8  ;;  %438 = vmatprep.subr.bf16.mxu1 %v462_v8 }
  0x1f   : > { %421 = vmatpush3.bf16.msra.mxu0 %v462_v8  ;;  %446 = vmatpush3.bf16.msra.mxu1 %v462_v8 }
  0x20   : > { %422 = vmatprep.subr.bf16.mxu0 %v463_v9  ;;  %439 = vmatprep.subr.bf16.mxu1 %v463_v9 }
  0x23   : > { %423 = vmatpush3.bf16.msra.mxu0 %v463_v9  ;;  %447 = vmatpush3.bf16.msra.mxu1 %v463_v9 }
  0x26   : > { %425 = vmatmul.mubr.bf16.vlgmr.msra.gmra.mrb[0].mxu0 %v466_v10  ;;  %429 = vmatmul.mubr.bf16.vlgmr.msra.gmra.mrb[0].mxu1 %v467_v11 }
  0xf9   : > { %v426_v12 = vpop.f32.mrb[0].mxu0  ;;  %v430_v13 = vpop.f32.mrb[0].mxu1 }
  0xfa   : > { %311 = vst [vmem:[%s145_s7 + $0x10] sm:$0xff] %v426_v12  ;;  %315 = vst [vmem:[%s145_s7 + $0x30] sm:$0xff] %v430_v13  ;;  %v278_v14 = vpop.f32.mrb[1].mxu0  ;;  %v294_v15 = vpop.f32.mrb[1].mxu1 }
  0xfb   : > { %309 = vst [vmem:[%s145_s7] sm:$0xff] %v278_v14  ;;  %313 = vst [vmem:[%s145_s7 + $0x20] sm:$0xff] %v294_v15  ;;  %v427_v16 = vpop.f32.mrb[2].mxu0  ;;  %v431_v17 = vpop.f32.mrb[2].mxu1 }
  0xfc   : > { %312 = vst [vmem:[%s145_s7 + $0x18] sm:$0xff] %v427_v16  ;;  %316 = vst [vmem:[%s145_s7 + $0x38] sm:$0xff] %v431_v17  ;;  %v281_v18 = vpop.f32.mrb[3].mxu0  ;;  %v297_v19 = vpop.f32.mrb[3].mxu1 }
  0xfd   : > { %310 = vst [vmem:[%s145_s7 + $0x8] sm:$0xff] %v281_v18  ;;  %314 = vst [vmem:[%s145_s7 + $0x28] sm:$0xff] %v297_v19 }
  0xfe PF: > { %s12_s9 = sadd.s32 1, %s474_s9  }
  0xff   : > { %p9_p4 = scmp.ge.s32.totalorder %s12_s9, 4  }
 0x101   :  { %11 = sbr.rel (!%p9_p4) target bundleno = 1 (0x1), region = 58 }

</bundles_post_ra>
